<compile_context>
chip_gen: v7x
topology: tpu7x:2x2x1
jax: 0.10.0
libtpu: 0.0.40
codegen_flags: <defaults>
</compile_context>

<pallas_src>
import functools

import jax
import jax.numpy as jnp
from jax import lax
from jax.experimental import pallas as pl
from jax.experimental.pallas import tpu as pltpu


# ---------------------------------------------------------------------------
# Pallas kernel 1: squared pairwise distance  ||new_xyz[s] - xyz[n]||^2
#   new_xyz block: (S, 3)  (S on sublanes, natural broadcast source)
#   xyz     block: (3, tn) (point axis lane-dense)
#   out     block: (S, tn)
# Pure VPU: 3 unrolled (sub, mul, add) broadcasts; no MXU, no transpose.
# ---------------------------------------------------------------------------
def _sqdist_kernel(new_xyz_ref, xyz_cf_ref, out_ref):
    src = new_xyz_ref[...]          # (S, 3)
    dst = xyz_cf_ref[...]           # (3, tn)
    acc = None
    for c in range(3):              # static unroll over the 3 coordinates
        diff = src[:, c:c + 1] - dst[c:c + 1, :]     # (S, 1) - (1, tn) -> (S, tn)
        sq = diff * diff
        acc = sq if acc is None else acc + sq
    out_ref[...] = acc              # exact, >= 0 (no cancellation)


def square_distance_pallas(new_xyz, xyz, *, tile_n=None):
    """||new_xyz[:, s] - xyz[:, n]||^2 -> (B, S, N) float32."""
    B, S, _ = new_xyz.shape
    N = xyz.shape[1]
    xyz_cf = jnp.swapaxes(xyz, 1, 2).astype(jnp.float32)   # (B, 3, N): lane-dense points
    new_xyz = new_xyz.astype(jnp.float32)

    if tile_n is None:
        tile_n = min(N, 2048) if (N % 128 == 0) else N
    if N % tile_n != 0:
        tile_n = N

    return pl.pallas_call(
        _sqdist_kernel,
        out_shape=jax.ShapeDtypeStruct((B, S, N), jnp.float32),
        grid=(B, N // tile_n),
        in_specs=[
            pl.BlockSpec((None, S, 3), lambda b, n: (b, 0, 0)),
            pl.BlockSpec((None, 3, tile_n), lambda b, n: (b, 0, n)),
        ],
        out_specs=pl.BlockSpec((None, S, tile_n), lambda b, n: (b, 0, n)),
        compiler_params=pltpu.CompilerParams(
            dimension_semantics=("parallel", "parallel"),
            vmem_limit_bytes=32 * 1024 * 1024,
        ),
    )(new_xyz, xyz_cf)


# ---------------------------------------------------------------------------
# Pallas kernel 2: shared MLP (two 1x1 convs w/ folded BN + ReLU) then max over
# the K neighbors.
#   feats: (K, tile_p, Cin)  ->  out block: (tile_p//pack, pack*C2), pack*C2 == 128
# ---------------------------------------------------------------------------
def _mlp_max_kernel(feat_ref, w1_ref, sb1_ref, w2_ref, sb2_ref, out_ref):
    K, tp, cin = feat_ref.shape
    c2 = w2_ref.shape[1]

    # one big matmul over all K*tile_p rows (keeps the MXU M-dim large)
    x = feat_ref[...].reshape(K * tp, cin).astype(jnp.bfloat16)

    # layer 1: 1x1 conv == matmul (bf16 MXU, f32 accumulate), folded BN, ReLU
    h = jnp.dot(x, w1_ref[...], preferred_element_type=jnp.float32)
    h = jnp.maximum(h * sb1_ref[0:1, :] + sb1_ref[1:2, :], 0.0)

    # layer 2
    h = jnp.dot(h.astype(jnp.bfloat16), w2_ref[...],
                preferred_element_type=jnp.float32)
    h = jnp.maximum(h * sb2_ref[0:1, :] + sb2_ref[1:2, :], 0.0)      # (K*tp, C2) f32

    # max over neighbors: K contiguous (tp, C2) slabs -> pure VPU maxima (no
    # strided cross-sublane reduction)
    m = h[0:tp, :]
    for k in range(1, K):
        m = jnp.maximum(m, h[k * tp:(k + 1) * tp, :])

    # lane-dense store: pack `pack` points per 128-lane output row
    pack = out_ref.shape[1] // c2
    if pack == 1:
        out_ref[...] = m
    else:
        g = tp // pack
        for j in range(pack):
            out_ref[:, j * c2:(j + 1) * c2] = m[j * g:(j + 1) * g, :]


def _choose_tile_p(P, K, cin, c1, c2, pack, budget_bytes=6 * 1024 * 1024):
    """Largest tile_p dividing P, multiple of max(8*pack, 16), fitting the VMEM budget.

    Budget is kept well below the scoped-VMEM default of every generation
    (16 MiB v5e / 32 MiB v6e / 32 MiB v7x) including double buffering.
    """
    step = max(8 * pack, 16)

    def fits(tp):
        feat = 2 * K * tp * cin * 2             # double-buffered bf16 input block
        inter = K * tp * (c1 + c2) * 4          # f32 matmul intermediates (rough)
        out = 2 * (tp // pack) * pack * c2 * 4  # double-buffered output block
        return feat + inter + out <= budget_bytes

    cands = [t for t in range(step, P + 1, step) if P % t == 0 and fits(t)]
    return max(cands) if cands else P           # tiny problems: single block


def mlp_max_pallas(feats_kpc, w1, sb1, w2, sb2):
    """feats_kpc: (K, P, Cin) -> (P, C2); two 1x1 convs (folded BN) + ReLU, max over K."""
    K, P, Cin = feats_kpc.shape
    C1 = w1.shape[1]
    C2 = w2.shape[1]

    # lane-dense output packing: pack points per row so the output last dim is 128
    pack = 1
    if C2 < 128 and 128 % C2 == 0 and P % (128 // C2) == 0:
        pack = 128 // C2

    tile_p = _choose_tile_p(P, K, Cin, C1, C2, pack)

    # bf16 feats halve HBM/DMA traffic; only when the block is bf16-tile aligned
    # (the tiny fallback single-block case keeps f32 and casts inside the kernel).
    feat_dtype = jnp.bfloat16 if tile_p % 16 == 0 else jnp.float32
    feats_kpc = feats_kpc.astype(feat_dtype)
    w1 = w1.astype(jnp.bfloat16)
    w2 = w2.astype(jnp.bfloat16)
    sb1 = sb1.astype(jnp.float32)
    sb2 = sb2.astype(jnp.float32)

    num_blocks = P // tile_p
    g = tile_p // pack

    out2d = pl.pallas_call(
        _mlp_max_kernel,
        out_shape=jax.ShapeDtypeStruct((P // pack, pack * C2), jnp.float32),
        grid=(num_blocks,),
        in_specs=[
            pl.BlockSpec((K, tile_p, Cin), lambda i: (0, i, 0)),
            pl.BlockSpec((Cin, C1), lambda i: (0, 0)),   # weights stay resident
            pl.BlockSpec((2, C1), lambda i: (0, 0)),
            pl.BlockSpec((C1, C2), lambda i: (0, 0)),
            pl.BlockSpec((2, C2), lambda i: (0, 0)),
        ],
        out_specs=pl.BlockSpec((tile_p // pack, pack * C2), lambda i: (i, 0)),
        compiler_params=pltpu.CompilerParams(
            dimension_semantics=("parallel",),
            vmem_limit_bytes=32 * 1024 * 1024,
        ),
    )(feats_kpc, w1, sb1, w2, sb2)

    if pack == 1:
        return out2d
    # unpack the lane-dense layout: out2d[i*g + r, j*C2 + c] == point i*tile_p + j*g + r
    out = out2d.reshape(num_blocks, g, pack, C2)
    out = jnp.transpose(out, (0, 2, 1, 3)).reshape(P, C2)
    return out


# ---------------------------------------------------------------------------
# Plain-JAX glue reproducing sample_and_group(knn=True)
# ---------------------------------------------------------------------------
def farthest_point_sample(xyz, npoint):
    # TODO(synk): PyTorch seeds FPS with torch.randint; we use index 0 for determinism.
    B, N, _ = xyz.shape

    def body(i, state):
        centroids, distance, farthest = state
        centroids = centroids.at[:, i].set(farthest)
        centroid = jnp.take_along_axis(xyz, farthest[:, None, None], axis=1)  # [B,1,3]
        dist = jnp.sum((xyz - centroid) ** 2, axis=-1)                        # [B,N]
        distance = jnp.minimum(distance, dist)
        farthest = jnp.argmax(distance, axis=-1).astype(jnp.int32)
        return centroids, distance, farthest

    centroids = jnp.zeros((B, npoint), dtype=jnp.int32)
    distance = jnp.full((B, N), 1e10, dtype=jnp.float32)
    farthest = jnp.zeros((B,), dtype=jnp.int32)
    centroids, _, _ = lax.fori_loop(0, npoint, body, (centroids, distance, farthest))
    return centroids


def index_points(points, idx):
    # points: [B, N, C], idx: [B, ...] -> [B, ..., C]
    return jax.vmap(lambda p, i: p[i])(points, idx)


def transition_down_forward(params, xyz, points, *, npoint, nsample):
    """TransitionDown.forward(xyz, points) -> (new_xyz [B,S,3], new_points [B,S,C_out])."""
    B, N, _ = xyz.shape
    D = points.shape[-1]

    # --- sample_and_group(npoint, radius=0, nsample, knn=True) ---
    fps_idx = farthest_point_sample(xyz, npoint)                       # [B, S]
    new_xyz = index_points(xyz, fps_idx)                               # [B, S, 3]
    dists = square_distance_pallas(new_xyz, xyz)                       # [B, S, N] (Pallas)
    # k nearest neighbors (ascending distance); top_k replaces the full O(N log N) argsort
    _, idx = lax.top_k(-dists, nsample)                                # [B, S, K]
    # TODO(synk): DMA-gather the K neighbors inside the MLP kernel instead of these XLA
    # gathers + HBM round trip of the grouped tensor.
    grouped_xyz = index_points(xyz, idx)                               # [B, S, K, 3]
    grouped_xyz_norm = grouped_xyz - new_xyz[:, :, None, :]            # [B, S, K, 3]
    grouped_points = index_points(points, idx)                         # [B, S, K, D]
    new_points = jnp.concatenate([grouped_xyz_norm, grouped_points], axis=-1)  # [B,S,K,C]

    # (B, S, K, C) -> (K, B*S, C): neighbor axis outermost so the in-kernel neighbor max
    # is K contiguous slab maxima (one-time XLA layout plumbing).
    feats = jnp.transpose(new_points, (2, 0, 1, 3)).reshape(nsample, B * npoint, 3 + D)

    out = mlp_max_pallas(feats, params["w1"], params["sb1"], params["w2"], params["sb2"])
    new_feats = out.reshape(B, npoint, -1)
    return new_xyz, new_feats


# ---------------------------------------------------------------------------
# Deterministic parameter init (Conv2d 1x1 weight+bias, BatchNorm2d folded).
# BatchNorm uses eval-mode semantics (running_mean=0, running_var=1 at init).
# ---------------------------------------------------------------------------
def init_params(key, channels):
    c_in, c1, c2 = channels
    ks = jax.random.split(key, 8)
    eps = 1e-5

    def fold(gamma, beta, conv_b, running_mean, running_var):
        scale = gamma / jnp.sqrt(running_var + eps)
        bias = beta + (conv_b - running_mean) * scale
        return jnp.stack([scale, bias], axis=0)  # (2, C)

    w1 = 0.1 * jax.random.normal(ks[0], (c_in, c1), jnp.float32)   # Conv2d weight^T
    b1 = 0.1 * jax.random.normal(ks[1], (c1,), jnp.float32)
    g1 = 1.0 + 0.1 * jax.random.normal(ks[2], (c1,), jnp.float32)  # BN gamma
    be1 = 0.1 * jax.random.normal(ks[3], (c1,), jnp.float32)       # BN beta

    w2 = 0.1 * jax.random.normal(ks[4], (c1, c2), jnp.float32)
    b2 = 0.1 * jax.random.normal(ks[5], (c2,), jnp.float32)
    g2 = 1.0 + 0.1 * jax.random.normal(ks[6], (c2,), jnp.float32)
    be2 = 0.1 * jax.random.normal(ks[7], (c2,), jnp.float32)

    zeros1, ones1 = jnp.zeros((c1,), jnp.float32), jnp.ones((c1,), jnp.float32)
    zeros2, ones2 = jnp.zeros((c2,), jnp.float32), jnp.ones((c2,), jnp.float32)
    return {
        "w1": w1, "sb1": fold(g1, be1, b1, zeros1, ones1),
        "w2": w2, "sb2": fold(g2, be2, b2, zeros2, ones2),
    }


if __name__ == "__main__":
    # TransitionDown(k=4, nneighbor=8, channels=[3 + D, 16, 32]) with D=4 features.
    B, N, D = 2, 16, 4
    k_npoint, nneighbor = 4, 8
    channels = [3 + D, 16, 32]

    key = jax.random.PRNGKey(0)
    k_xyz, k_pts, k_par = jax.random.split(key, 3)
    xyz = jax.random.normal(k_xyz, (B, N, 3), jnp.float32)
    points = jax.random.normal(k_pts, (B, N, D), jnp.float32)
    params = init_params(k_par, channels)

    fwd = jax.jit(functools.partial(transition_down_forward,
                                    npoint=k_npoint, nsample=nneighbor))
    new_xyz, new_points = fwd(params, xyz, points)
    jax.block_until_ready((new_xyz, new_points))

    assert new_xyz.shape == (B, k_npoint, 3)
    assert new_points.shape == (B, k_npoint, channels[-1])
    print("KERNEL_OK")
</pallas_src>

<mosaic_0001>
module attributes {stable_mosaic.version = 11 : i64} {
  func.func @_sqdist_kernel(%arg0: i32, %arg1: i32, %arg2: memref<1x4x3xf32, #tpu.memory_space<vmem>>, %arg3: memref<1x3x16xf32, #tpu.memory_space<vmem>>, %arg4: memref<1x4x16xf32, #tpu.memory_space<vmem>>) attributes {dimension_semantics = [#tpu.dimension_semantics<parallel>, #tpu.dimension_semantics<parallel>], iteration_bounds = array<i64: 2, 1>, scalar_prefetch = 0 : i64, scratch_operands = 0 : i64, tpu.core_type = #tpu.core_type<tc>, window_params = [{transform_indices = @transform_0, window_bounds = array<i64: 1, 4, 3>}, {transform_indices = @transform_1, window_bounds = array<i64: 1, 3, 16>}, {transform_indices = @transform_2, window_bounds = array<i64: 1, 4, 16>}]} {
    %c0 = arith.constant 0 : index
    %c0_0 = arith.constant 0 : index
    %c0_1 = arith.constant 0 : index
    %0 = vector.load %arg2[%c0, %c0_0, %c0_1] : memref<1x4x3xf32, #tpu.memory_space<vmem>>, vector<1x4x3xf32>
    %1 = vector.shape_cast %0 : vector<1x4x3xf32> to vector<4x3xf32>
    %c0_2 = arith.constant 0 : index
    %c0_3 = arith.constant 0 : index
    %c0_4 = arith.constant 0 : index
    %2 = vector.load %arg3[%c0_2, %c0_3, %c0_4] : memref<1x3x16xf32, #tpu.memory_space<vmem>>, vector<1x3x16xf32>
    %3 = vector.shape_cast %2 : vector<1x3x16xf32> to vector<3x16xf32>
    %4 = vector.extract_strided_slice %1 {offsets = [0, 0], sizes = [4, 1], strides = [1, 1]} : vector<4x3xf32> to vector<4x1xf32>
    %5 = vector.extract_strided_slice %3 {offsets = [0, 0], sizes = [1, 16], strides = [1, 1]} : vector<3x16xf32> to vector<1x16xf32>
    %6 = vector.broadcast %4 : vector<4x1xf32> to vector<4x16xf32>
    %7 = vector.broadcast %5 : vector<1x16xf32> to vector<4x16xf32>
    %8 = arith.subf %6, %7 : vector<4x16xf32>
    %9 = arith.mulf %8, %8 : vector<4x16xf32>
    %10 = vector.extract_strided_slice %1 {offsets = [0, 1], sizes = [4, 1], strides = [1, 1]} : vector<4x3xf32> to vector<4x1xf32>
    %11 = vector.extract_strided_slice %3 {offsets = [1, 0], sizes = [1, 16], strides = [1, 1]} : vector<3x16xf32> to vector<1x16xf32>
    %12 = vector.broadcast %10 : vector<4x1xf32> to vector<4x16xf32>
    %13 = vector.broadcast %11 : vector<1x16xf32> to vector<4x16xf32>
    %14 = arith.subf %12, %13 : vector<4x16xf32>
    %15 = arith.mulf %14, %14 : vector<4x16xf32>
    %16 = arith.addf %9, %15 : vector<4x16xf32>
    %17 = vector.extract_strided_slice %1 {offsets = [0, 2], sizes = [4, 1], strides = [1, 1]} : vector<4x3xf32> to vector<4x1xf32>
    %18 = vector.extract_strided_slice %3 {offsets = [2, 0], sizes = [1, 16], strides = [1, 1]} : vector<3x16xf32> to vector<1x16xf32>
    %19 = vector.broadcast %17 : vector<4x1xf32> to vector<4x16xf32>
    %20 = vector.broadcast %18 : vector<1x16xf32> to vector<4x16xf32>
    %21 = arith.subf %19, %20 : vector<4x16xf32>
    %22 = arith.mulf %21, %21 : vector<4x16xf32>
    %23 = arith.addf %16, %22 : vector<4x16xf32>
    %c0_5 = arith.constant 0 : index
    %c0_6 = arith.constant 0 : index
    %c0_7 = arith.constant 0 : index
    %24 = vector.load %arg4[%c0_5, %c0_6, %c0_7] : memref<1x4x16xf32, #tpu.memory_space<vmem>>, vector<1x4x16xf32>
    %25 = vector.shape_cast %24 : vector<1x4x16xf32> to vector<4x16xf32>
    %26 = vector.shape_cast %23 : vector<4x16xf32> to vector<1x4x16xf32>
    tpu.vector_store %arg4[%c0_5, %c0_6, %c0_7], %26 {strides = array<i32>} : memref<1x4x16xf32, #tpu.memory_space<vmem>>, vector<1x4x16xf32>,
    return
  }
  func.func @transform_0(%arg0: i32, %arg1: i32) -> (i32, i32, i32) {
    %c0_i32 = arith.constant 0 : i32
    %c0_i32_0 = arith.constant 0 : i32
    %c0_i32_1 = arith.constant 0 : i32
    return %arg0, %c0_i32, %c0_i32_0 : i32, i32, i32
  }
  func.func @transform_1(%arg0: i32, %arg1: i32) -> (i32, i32, i32) {
    %c0_i32 = arith.constant 0 : i32
    %c0_i32_0 = arith.constant 0 : i32
    return %arg0, %c0_i32, %arg1 : i32, i32, i32
  }
  func.func @transform_2(%arg0: i32, %arg1: i32) -> (i32, i32, i32) {
    %c0_i32 = arith.constant 0 : i32
    %c0_i32_0 = arith.constant 0 : i32
    return %arg0, %c0_i32, %arg1 : i32, i32, i32
  }
}

module attributes {stable_mosaic.version = 11 : i64} {
  func.func @_mlp_max_kernel(%arg0: i32, %arg1: memref<8x8x7xf32, #tpu.memory_space<vmem>>, %arg2: memref<7x16xbf16, #tpu.memory_space<vmem>>, %arg3: memref<2x16xf32, #tpu.memory_space<vmem>>, %arg4: memref<16x32xbf16, #tpu.memory_space<vmem>>, %arg5: memref<2x32xf32, #tpu.memory_space<vmem>>, %arg6: memref<2x128xf32, #tpu.memory_space<vmem>>) attributes {dimension_semantics = [#tpu.dimension_semantics<parallel>], iteration_bounds = array<i64: 1>, scalar_prefetch = 0 : i64, scratch_operands = 0 : i64, tpu.core_type = #tpu.core_type<tc>, window_params = [{transform_indices = @transform_0, window_bounds = array<i64: 8, 8, 7>}, {pipeline_mode = #tpu.pipeline_mode<synchronous>, transform_indices = @transform_1, window_bounds = array<i64: 7, 16>}, {pipeline_mode = #tpu.pipeline_mode<synchronous>, transform_indices = @transform_2, window_bounds = array<i64: 2, 16>}, {pipeline_mode = #tpu.pipeline_mode<synchronous>, transform_indices = @transform_3, window_bounds = array<i64: 16, 32>}, {pipeline_mode = #tpu.pipeline_mode<synchronous>, transform_indices = @transform_4, window_bounds = array<i64: 2, 32>}, {transform_indices = @transform_5, window_bounds = array<i64: 2, 128>}]} {
    %c0 = arith.constant 0 : index
    %c0_0 = arith.constant 0 : index
    %c0_1 = arith.constant 0 : index
    %0 = vector.load %arg1[%c0, %c0_0, %c0_1] : memref<8x8x7xf32, #tpu.memory_space<vmem>>, vector<8x8x7xf32>
    %1 = vector.shape_cast %0 : vector<8x8x7xf32> to vector<64x7xf32>
    %2 = arith.truncf %1 : vector<64x7xf32> to vector<64x7xbf16>
    %c0_2 = arith.constant 0 : index
    %c0_3 = arith.constant 0 : index
    %3 = vector.load %arg2[%c0_2, %c0_3] : memref<7x16xbf16, #tpu.memory_space<vmem>>, vector<7x16xbf16>
    %cst = arith.constant dense<0.000000e+00> : vector<64x16xf32>
    %4 = tpu.matmul %2, %3, %cst {dimension_numbers = #tpu.dot_dimension_numbers<[1], [0], [0], [1], [0, 0, 1, 1], [], []>} : vector<64x7xbf16>, vector<7x16xbf16>, vector<64x16xf32> -> vector<64x16xf32>
    %c0_4 = arith.constant 0 : index
    %c0_5 = arith.constant 0 : index
    %5 = vector.load %arg3[%c0_4, %c0_5] : memref<2x16xf32, #tpu.memory_space<vmem>>, vector<1x16xf32>
    %6 = vector.broadcast %5 : vector<1x16xf32> to vector<64x16xf32>
    %7 = arith.mulf %4, %6 : vector<64x16xf32>
    %c1 = arith.constant 1 : index
    %c0_6 = arith.constant 0 : index
    %8 = vector.load %arg3[%c1, %c0_6] : memref<2x16xf32, #tpu.memory_space<vmem>>, vector<1x16xf32>
    %9 = vector.broadcast %8 : vector<1x16xf32> to vector<64x16xf32>
    %10 = arith.addf %7, %9 : vector<64x16xf32>
    %cst_7 = arith.constant 0.000000e+00 : f32
    %11 = vector.broadcast %cst_7 : f32 to vector<64x16xf32>
    %12 = arith.maximumf %10, %11 : vector<64x16xf32>
    %13 = arith.truncf %12 : vector<64x16xf32> to vector<64x16xbf16>
    %c0_8 = arith.constant 0 : index
    %c0_9 = arith.constant 0 : index
    %14 = vector.load %arg4[%c0_8, %c0_9] : memref<16x32xbf16, #tpu.memory_space<vmem>>, vector<16x32xbf16>
    %cst_10 = arith.constant dense<0.000000e+00> : vector<64x32xf32>
    %15 = tpu.matmul %13, %14, %cst_10 {dimension_numbers = #tpu.dot_dimension_numbers<[1], [0], [0], [1], [0, 0, 1, 1], [], []>} : vector<64x16xbf16>, vector<16x32xbf16>, vector<64x32xf32> -> vector<64x32xf32>
    %c0_11 = arith.constant 0 : index
    %c0_12 = arith.constant 0 : index
    %16 = vector.load %arg5[%c0_11, %c0_12] : memref<2x32xf32, #tpu.memory_space<vmem>>, vector<1x32xf32>
    %17 = vector.broadcast %16 : vector<1x32xf32> to vector<64x32xf32>
    %18 = arith.mulf %15, %17 : vector<64x32xf32>
    %c1_13 = arith.constant 1 : index
    %c0_14 = arith.constant 0 : index
    %19 = vector.load %arg5[%c1_13, %c0_14] : memref<2x32xf32, #tpu.memory_space<vmem>>, vector<1x32xf32>
    %20 = vector.broadcast %19 : vector<1x32xf32> to vector<64x32xf32>
    %21 = arith.addf %18, %20 : vector<64x32xf32>
    %cst_15 = arith.constant 0.000000e+00 : f32
    %22 = vector.broadcast %cst_15 : f32 to vector<64x32xf32>
    %23 = arith.maximumf %21, %22 : vector<64x32xf32>
    %24 = vector.extract_strided_slice %23 {offsets = [0, 0], sizes = [8, 32], strides = [1, 1]} : vector<64x32xf32> to vector<8x32xf32>
    %25 = vector.extract_strided_slice %23 {offsets = [8, 0], sizes = [8, 32], strides = [1, 1]} : vector<64x32xf32> to vector<8x32xf32>
    %26 = arith.maximumf %24, %25 : vector<8x32xf32>
    %27 = vector.extract_strided_slice %23 {offsets = [16, 0], sizes = [8, 32], strides = [1, 1]} : vector<64x32xf32> to vector<8x32xf32>
    %28 = arith.maximumf %26, %27 : vector<8x32xf32>
    %29 = vector.extract_strided_slice %23 {offsets = [24, 0], sizes = [8, 32], strides = [1, 1]} : vector<64x32xf32> to vector<8x32xf32>
    %30 = arith.maximumf %28, %29 : vector<8x32xf32>
    %31 = vector.extract_strided_slice %23 {offsets = [32, 0], sizes = [8, 32], strides = [1, 1]} : vector<64x32xf32> to vector<8x32xf32>
    %32 = arith.maximumf %30, %31 : vector<8x32xf32>
    %33 = vector.extract_strided_slice %23 {offsets = [40, 0], sizes = [8, 32], strides = [1, 1]} : vector<64x32xf32> to vector<8x32xf32>
    %34 = arith.maximumf %32, %33 : vector<8x32xf32>
    %35 = vector.extract_strided_slice %23 {offsets = [48, 0], sizes = [8, 32], strides = [1, 1]} : vector<64x32xf32> to vector<8x32xf32>
    %36 = arith.maximumf %34, %35 : vector<8x32xf32>
    %37 = vector.extract_strided_slice %23 {offsets = [56, 0], sizes = [8, 32], strides = [1, 1]} : vector<64x32xf32> to vector<8x32xf32>
    %38 = arith.maximumf %36, %37 : vector<8x32xf32>
    %39 = vector.extract_strided_slice %38 {offsets = [0, 0], sizes = [2, 32], strides = [1, 1]} : vector<8x32xf32> to vector<2x32xf32>
    %c0_16 = arith.constant 0 : index
    %c0_17 = arith.constant 0 : index
    %40 = vector.load %arg6[%c0_16, %c0_17] : memref<2x128xf32, #tpu.memory_space<vmem>>, vector<2x32xf32>
    tpu.vector_store %arg6[%c0_16, %c0_17], %39 {strides = array<i32>} : memref<2x128xf32, #tpu.memory_space<vmem>>, vector<2x32xf32>,
    %41 = vector.extract_strided_slice %38 {offsets = [2, 0], sizes = [2, 32], strides = [1, 1]} : vector<8x32xf32> to vector<2x32xf32>
    %c0_18 = arith.constant 0 : index
    %c32 = arith.constant 32 : index
    %42 = vector.load %arg6[%c0_18, %c32] : memref<2x128xf32, #tpu.memory_space<vmem>>, vector<2x32xf32>
    tpu.vector_store %arg6[%c0_18, %c32], %41 {strides = array<i32>} : memref<2x128xf32, #tpu.memory_space<vmem>>, vector<2x32xf32>,
    %43 = vector.extract_strided_slice %38 {offsets = [4, 0], sizes = [2, 32], strides = [1, 1]} : vector<8x32xf32> to vector<2x32xf32>
    %c0_19 = arith.constant 0 : index
    %c64 = arith.constant 64 : index
    %44 = vector.load %arg6[%c0_19, %c64] : memref<2x128xf32, #tpu.memory_space<vmem>>, vector<2x32xf32>
    tpu.vector_store %arg6[%c0_19, %c64], %43 {strides = array<i32>} : memref<2x128xf32, #tpu.memory_space<vmem>>, vector<2x32xf32>,
    %45 = vector.extract_strided_slice %38 {offsets = [6, 0], sizes = [2, 32], strides = [1, 1]} : vector<8x32xf32> to vector<2x32xf32>
    %c0_20 = arith.constant 0 : index
    %c96 = arith.constant 96 : index
    %46 = vector.load %arg6[%c0_20, %c96] : memref<2x128xf32, #tpu.memory_space<vmem>>, vector<2x32xf32>
    tpu.vector_store %arg6[%c0_20, %c96], %45 {strides = array<i32>} : memref<2x128xf32, #tpu.memory_space<vmem>>, vector<2x32xf32>,
    return
  }
  func.func @transform_0(%arg0: i32) -> (i32, i32, i32) {
    %c0_i32 = arith.constant 0 : i32
    %c0_i32_0 = arith.constant 0 : i32
    %c0_i32_1 = arith.constant 0 : i32
    return %c0_i32, %arg0, %c0_i32_0 : i32, i32, i32
  }
  func.func @transform_1(%arg0: i32) -> (i32, i32) {
    %c0_i32 = arith.constant 0 : i32
    %c0_i32_0 = arith.constant 0 : i32
    %c0_i32_1 = arith.constant 0 : i32
    return %c0_i32, %c0_i32_0 : i32, i32
  }
  func.func @transform_2(%arg0: i32) -> (i32, i32) {
    %c0_i32 = arith.constant 0 : i32
    %c0_i32_0 = arith.constant 0 : i32
    %c0_i32_1 = arith.constant 0 : i32
    return %c0_i32, %c0_i32_0 : i32, i32
  }
  func.func @transform_3(%arg0: i32) -> (i32, i32) {
    %c0_i32 = arith.constant 0 : i32
    %c0_i32_0 = arith.constant 0 : i32
    %c0_i32_1 = arith.constant 0 : i32
    return %c0_i32, %c0_i32_0 : i32, i32
  }
  func.func @transform_4(%arg0: i32) -> (i32, i32) {
    %c0_i32 = arith.constant 0 : i32
    %c0_i32_0 = arith.constant 0 : i32
    %c0_i32_1 = arith.constant 0 : i32
    return %c0_i32, %c0_i32_0 : i32, i32
  }
  func.func @transform_5(%arg0: i32) -> (i32, i32) {
    %c0_i32 = arith.constant 0 : i32
    %c0_i32_0 = arith.constant 0 : i32
    return %arg0, %c0_i32 : i32, i32
  }
}

</mosaic_0001>

<bundles_post_ra>
// kernel: custom-call.8
= control target key start
LH: loop header
LB: loop body
LE: loop exit
PB: predicated region body
PF: predicated region fallthrough
CT: control target
= control target key end

     0   :  { %s6_s0 = inlined_call_operand.vmem [shape: f32[2,16], index: 0, kind: output, shape index: {}]  }

// kernel: neg.1
= control target key start
LH: loop header
LB: loop body
LE: loop exit
PB: predicated region body
PF: predicated region fallthrough
CT: control target
= control target key end

     0   :  { %s40_s0 = inlined_call_operand.vmem [shape: f32[2,4,16], index: 0, kind: input, shape index: {}]   ;;  %s41_s1 = inlined_call_operand.vmem [shape: f32[2,4,16], index: 1, kind: output, shape index: {}]  }
   0x1   :  { %v2_v0 = vld [vmem:[%s40_s0] sm:$0xf]  ;;  %v16_v1 = vld [vmem:[%s40_s0 + $0x4] sm:$0xf] }
   0x2   :  { %v5_v2 = vxor.u32 2147483648, %v2_v0  ;;  %v12_v3 = vxor.u32 2147483648, %v16_v1 }
   0x4   :  { %7 = vst [vmem:[%s41_s1] sm:$0xf] %v5_v2  ;;  %17 = vst [vmem:[%s41_s1 + $0x4] sm:$0xf] %v12_v3 }

// kernel: transition_down_forward.2
= control target key start
LH: loop header
LB: loop body
LE: loop exit
PB: predicated region body
PF: predicated region fallthrough
CT: control target
= control target key end

     0   :  { %s393_s9 = smov 0   ;;  %s395_s10 = smov 0   ;;  %s434_s0 = inlined_call_operand.vmem [shape: f32[2,4,3], index: 0, kind: input, shape index: {}]   ;;  %s435_s1 = inlined_call_operand.vmem [shape: f32[2,3,16], index: 1, kind: input, shape index: {}]   ;;  %s436_s2 = inlined_call_operand.vmem [shape: f32[2,4,16], index: 2, kind: output, shape index: {}]  }
   0x1   :  { %s397_s11 = smov 0  }
   0x2 LB: > { %s24_s12 = sadd.s32 1, %s369_s10  ;;  %p314_p0 = scmp.ge.s32.totalorder %s373_s11, 1  ;;  %s373_s11 = sphi %s397_s11, %s12_s11   ;;  %s369_s10 = sphi %s395_s10, %s438_s10   ;;  %s365_s9 = sphi %s393_s9, %s437_s9  }
   0x3   : > { %p26_p1 = scmp.ge.s32.totalorder %s24_s12, 2  ;;  %p139_p2 = scmp.lt.s32.totalorder %s373_s11, 3 }
   0x5   : > { %s440_s12 = smov (%p26_p1, %s24_s12), 0  ;;  %p140_p3 = pnand %p314_p0, %p139_p2 }
   0x6   : > { %p169_p4 = scmp.lt.s32.totalorder (!%p140_p3), %s365_s9, 1  ;;  %v375_v0 = vmov (!%p140_p3), 0   ;;  %v376_v1 = vmov (!%p140_p3), 2   ;;  %v377_v3 = vmov (!%p140_p3), 1   ;;  %v194_v4 = vlaneseq (!%p140_p3) }
   0x7   : > { %143 = sbr.rel (%p140_p3) target bundleno = 160 (0xa0), region = 28  ;;  %347 = vset.pattern.permute.xlu0 (!%p140_p3), %v375_v0  ;;  %349 = vset.pattern.permute.xlu1 (!%p140_p3), %v376_v1  ;;  %vm222_vm0 = vcmask (!%p140_p3), 125952  }
   0x8   : > { %v195_v5 = vshrl.u32 (!%p140_p3), %v194_v4, 7 }
   0xa   : > { %v196_v6 = vsub.s32 (!%p140_p3), 0, %v195_v5  ;;  %v217_v7 = vsub.s32 (!%p140_p3), 2, %v195_v5  ;;  %v206_v9 = vsub.s32 (!%p140_p3), 1, %v195_v5 }
   0xe   : > { %s442_s9 = smov (!%p169_p4, %s365_s9), 1 }
   0xf   : > { %s411_s13 = sshll.u32 %s442_s9, 2 }
  0x10   : > { %s172_s16 = scalar_lea.vmem %s434_s0, %s411_s13  ;;  %s179_s19 = scalar_lea.vmem %s435_s1, %s411_s13 }
  0x11   : > { %v187_v2 = vld [vmem:[%s172_s16] sm:$0xf]  ;;  %s186_s22 = scalar_lea.vmem %s436_s2, %s411_s13 }
  0x12   : > { %191 = vperm.xlu0 %347, %v187_v2   ;;  %212 = vperm.xlu1 %349, %v187_v2   ;;  %v188_v8 = vld [vmem:[%s179_s19] sm:$0x7] }
  0x13   : > { %v197_v10 = vrot.slane %v188_v8, %v196_v6  ;;  %v218_v12 = vrot.slane %v188_v8, %v217_v7  ;;  %v207_v14 = vrot.slane %v188_v8, %v206_v9 }
  0x16   : > { %348 = vset.pattern.permute.xlu0 %v377_v3 }
  0x17   : > { %201 = vperm.xlu0 %348, %v187_v2  }
  0x1b   : > { %350 = vset.pattern.permute.xlu0 %v376_v1 }
  0x91   : > { %v192_v11 = vpop.permute.xlu0 %191  ;;  %v213_v13 = vpop.permute.xlu1 %212 }
  0x92   : > { %v198_v15 = vsub.f32 %v192_v11, %v197_v10  ;;  %v219_v16 = vsub.f32 %v213_v13, %v218_v12 }
  0x94   : > { %v199_v19 = vmul.f32 %v198_v15, %v198_v15  ;;  %v220_v21 = vmul.f32 %v219_v16, %v219_v16 }
  0x96   : > { %v202_v17 = vpop.permute.xlu0 %201 }
  0x97   : > { %v208_v18 = vsub.f32 %v202_v17, %v207_v14 }
  0x99   : > { %v209_v20 = vmul.f32 %v208_v18, %v208_v18 }
  0x9b   : > { %v210_v22 = vadd.f32 %v209_v20, %v199_v19 }
  0x9d   : > { %v221_v23 = vadd.f32 %v220_v21, %v210_v22 }
  0x9f   : > { %223 = vst.msk [vmem:[%s186_s22] sm:$0xf] %vm222_vm0, %v221_v23 }
  0xa0 PF: > { %s12_s11 = sadd.s32 1, %s373_s11   ;;  %s437_s9 = smov %s369_s10 }
  0xa1   : > { %p9_p5 = scmp.ge.s32.totalorder %s12_s11, 4   ;;  %s438_s10 = smov %s440_s12 }
  0xa3   :  { %11 = sbr.rel (!%p9_p5) target bundleno = 2 (0x2), region = 61 }

// kernel: transition_down_forward.3
= control target key start
LH: loop header
LB: loop body
LE: loop exit
PB: predicated region body
PF: predicated region fallthrough
CT: control target
= control target key end

     0   :  { %vm47_vm0 = vcmask 1042432   ;;  %vm48_vm1 = vcmask 1043456   ;;  %v354_v1 = vmov 65535   ;;  %vm34_vm2 = vcmask 56320   ;;  %s356_s17 = smov 32   ;;  %s357_s20 = smov 64   ;;  %s450_s1 = inlined_call_operand.vmem [shape: bf16[7,16], index: 1, kind: input, shape index: {}]   ;;  %s451_s0 = inlined_call_operand.vmem [shape: f32[8,8,7], index: 0, kind: input, shape index: {}]   ;;  %s452_s3 = inlined_call_operand.vmem [shape: bf16[16,32], index: 3, kind: input, shape index: {}]   ;;  %s453_s2 = inlined_call_operand.vmem [shape: f32[2,16], index: 2, kind: input, shape index: {}]   ;;  %s454_s4 = inlined_call_operand.vmem [shape: f32[2,32], index: 4, kind: input, shape index: {}]   ;;  %s455_s5 = inlined_call_operand.vmem [shape: f32[2,128], index: 5, kind: output, shape index: {}]  }
   0x1   :  { %v33_v0 = vld [vmem:[%s450_s1] sm:$0xf]  ;;  %v49_v2 = vsel %vm47_vm0, 4294967295, %v354_v1  ;;  %v22_v4 = vld [vmem:[%s451_s0 + $0x8] sm:$0xff]  ;;  %v23_v7 = vld [vmem:[%s451_s0 + $0x10] sm:$0xff]  ;;  %vm165_vm3 = vcmask 130048  }
   0x2   :  { %v21_v3 = vld [vmem:[%s451_s0] sm:$0xff]  ;;  %v50_v5 = vsel %vm48_vm1, %v49_v2, 0  ;;  %v24_v8 = vld [vmem:[%s451_s0 + $0x18] sm:$0xff]  ;;  %v26_v11 = vld [vmem:[%s451_s0 + $0x28] sm:$0xff]  ;;  %vm284_vm4 = vcmask 254976   ;;  %vm290_vm5 = vcmask 519426  }
   0x3   :  { %v29_v6 = vpack.c.bf16 %v22_v4, %v21_v3  ;;  %v52_v9 = vand.u32 %v50_v5, %v33_v0  ;;  %v25_v10 = vld [vmem:[%s451_s0 + $0x20] sm:$0xff]  ;;  %v30_v12 = vpack.c.bf16 %v24_v8, %v23_v7  ;;  %v27_v14 = vld [vmem:[%s451_s0 + $0x30] sm:$0xff]  ;;  %v28_v15 = vld [vmem:[%s451_s0 + $0x38] sm:$0xff]  ;;  %vm295_vm6 = vcmask 783876  }
   0x4   :  { %v31_v13 = vpack.c.bf16 %v26_v11, %v25_v10  ;;  %v32_v16 = vpack.c.bf16 %v28_v15, %v27_v14  ;;  %v353_v17 = vld [vmem:[%s452_s3] sm:$0xff]   ;;  %vm300_vm7 = vcmask 1048326  }
   0x5   :  { %331 = vmatprep.mubr.msk.bf16.mxu0 %vm34_vm2, %v29_v6  ;;  %329 = vmatprep.subr.bf16.mxu0 %v52_v9  ;;  %v310_v18 = vld [vmem:[%s453_s2] ss:$0 sm:$0xff]  ;;  %v311_v20 = vld [vmem:[%s453_s2 + $0x1] ss:$0 sm:$0xff] }
   0x6   :  { %330 = vmatpush3.bf16.msra.mxu0 %v52_v9  ;;  %339 = vmatprep.subr.bf16.mxu1 %v353_v17  ;;  %v317_v56 = vld [vmem:[%s454_s4] ss:$0 sm:$0xff]  ;;  %v318_v58 = vld [vmem:[%s454_s4 + $0x1] ss:$0 sm:$0xff]  ;;  %s355_s4 = smov 96  }
   0x7   :  { %340 = vmatpush3.bf16.msra.mxu1 %v353_v17 }
   0x9   :  { %332 = vmatmul.mubr.msk.bf16.vlgmr.msra.gmra.mrb[0].mxu0 %vm34_vm2, %v30_v12 }
   0xa   :  { %335 = vmatprep.mubr.msk.bf16.mxu0 %vm34_vm2, %v31_v13 }
  0x11   :  { %336 = vmatmul.mubr.msk.bf16.gmra.mrb[4].mxu0 %vm34_vm2, %v32_v16 }
  0xdc   :  { %v333_v19 = vpop.f32.mrb[0].mxu0 }
  0xdd   :  { %v126_v21 = vmul.f32 %v333_v19, %v310_v18  ;;  %v88_v22 = vpop.f32.mrb[1].mxu0 }
  0xde   :  { %v124_v23 = vmul.f32 %v310_v18, %v88_v22  ;;  %v334_v24 = vpop.f32.mrb[2].mxu0 }
  0xdf   :  { %v139_v25 = vadd.f32 %v311_v20, %v126_v21  ;;  %v127_v26 = vmul.f32 %v334_v24, %v310_v18  ;;  %v91_v27 = vpop.f32.mrb[3].mxu0 }
  0xe0   :  { %v137_v28 = vadd.f32 %v311_v20, %v124_v23  ;;  %v125_v29 = vmul.f32 %v310_v18, %v91_v27 }
  0xe1   :  { %v140_v30 = vadd.f32 %v311_v20, %v127_v26  ;;  %v147_v32 = vmax.f32 %v139_v25, 0.0 }
  0xe2   :  { %v138_v31 = vadd.f32 %v311_v20, %v125_v29  ;;  %v145_v34 = vmax.f32 %v137_v28, 0.0 }
  0xe3   :  { %v148_v33 = vmax.f32 %v140_v30, 0.0 }
  0xe4   :  { %v146_v35 = vmax.f32 %v138_v31, 0.0  ;;  %v337_v36 = vpop.f32.mrb[4].mxu0 }
  0xe5   :  { %v154_v37 = vpack.c.bf16 %v148_v33, %v147_v32  ;;  %v130_v38 = vmul.f32 %v337_v36, %v310_v18  ;;  %v104_v39 = vpop.f32.mrb[5].mxu0 }
  0xe6   :  { %v128_v40 = vmul.f32 %v310_v18, %v104_v39  ;;  %v338_v41 = vpop.f32.mrb[6].mxu0  ;;  %v153_v42 = vpack.c.bf16 %v146_v35, %v145_v34 }
  0xe7   :  { %v143_v43 = vadd.f32 %v311_v20, %v130_v38  ;;  %v131_v44 = vmul.f32 %v338_v41, %v310_v18  ;;  %v107_v45 = vpop.f32.mrb[7].mxu0 }
  0xe8   :  { %v141_v46 = vadd.f32 %v311_v20, %v128_v40  ;;  %v129_v47 = vmul.f32 %v310_v18, %v107_v45  ;;  %341 = vmatprep.mubr.msk.bf16.mxu1 %vm165_vm3, %v153_v42 }
  0xe9   :  { %v144_v48 = vadd.f32 %v311_v20, %v131_v44  ;;  %342 = vmatmul.mubr.msk.bf16.vlgmr.msra.gmra.mrb[0].mxu1 %vm165_vm3, %v154_v37  ;;  %v151_v50 = vmax.f32 %v143_v43, 0.0 }
  0xea   :  { %v142_v49 = vadd.f32 %v311_v20, %v129_v47  ;;  %v149_v52 = vmax.f32 %v141_v46, 0.0 }
  0xeb   :  { %v152_v51 = vmax.f32 %v144_v48, 0.0 }
  0xec   :  { %v150_v53 = vmax.f32 %v142_v49, 0.0 }
  0xed   :  { %v156_v54 = vpack.c.bf16 %v152_v51, %v151_v50 }
  0xee   :  { %v155_v55 = vpack.c.bf16 %v150_v53, %v149_v52 }
  0xf0   :  { %345 = vmatprep.mubr.msk.bf16.mxu1 %vm165_vm3, %v155_v55 }
  0xf1   :  { %346 = vmatmul.mubr.msk.bf16.gmra.mrb[4].mxu1 %vm165_vm3, %v156_v54 }
 0x1bc   :  { %v343_v57 = vpop.f32.mrb[0].mxu1 }
 0x1bd   :  { %v212_v59 = vpop.f32.mrb[1].mxu1  ;;  %v250_v60 = vmul.f32 %v343_v57, %v317_v56 }
 0x1be   :  { %v248_v61 = vmul.f32 %v317_v56, %v212_v59  ;;  %v344_v62 = vpop.f32.mrb[2].mxu1 }
 0x1bf   :  { %v251_v63 = vmul.f32 %v344_v62, %v317_v56  ;;  %v215_v0 = vpop.f32.mrb[3].mxu1  ;;  %v263_v3 = vadd.f32 %v318_v58, %v250_v60 }
 0x1c0   :  { %v261_v1 = vadd.f32 %v318_v58, %v248_v61  ;;  %v249_v2 = vmul.f32 %v317_v56, %v215_v0 }
 0x1c1   :  { %v264_v5 = vadd.f32 %v318_v58, %v251_v63  ;;  %v271_v10 = vmax.f32 %v263_v3, 0.0 }
 0x1c2   :  { %v262_v4 = vadd.f32 %v318_v58, %v249_v2  ;;  %v269_v6 = vmax.f32 %v261_v1, 0.0 }
 0x1c3   :  { %v272_v15 = vmax.f32 %v264_v5, 0.0 }
 0x1c4   :  { %v270_v7 = vmax.f32 %v262_v4, 0.0  ;;  %v347_v8 = vpop.f32.mrb[4].mxu1 }
 0x1c5   :  { %v228_v9 = vpop.f32.mrb[5].mxu1  ;;  %v254_v12 = vmul.f32 %v347_v8, %v317_v56 }
 0x1c6   :  { %v277_v11 = vmax.f32 %v269_v6, %v270_v7  ;;  %v252_v13 = vmul.f32 %v317_v56, %v228_v9  ;;  %v348_v14 = vpop.f32.mrb[6].mxu1 }
 0x1c7   :  { %v231_v16 = vpop.f32.mrb[7].mxu1  ;;  %v255_v19 = vmul.f32 %v348_v14, %v317_v56  ;;  %v267_v21 = vadd.f32 %v318_v58, %v254_v12 }
 0x1c8   :  { %v278_v17 = vmax.f32 %v277_v11, %v271_v10  ;;  %v265_v18 = vadd.f32 %v318_v58, %v252_v13  ;;  %v253_v20 = vmul.f32 %v317_v56, %v231_v16 }
 0x1c9   :  { %v268_v26 = vadd.f32 %v318_v58, %v255_v19  ;;  %v275_v28 = vmax.f32 %v267_v21, 0.0 }
 0x1ca   :  { %v273_v22 = vmax.f32 %v265_v18, 0.0  ;;  %v279_v23 = vmax.f32 %v278_v17, %v272_v15  ;;  %v266_v24 = vadd.f32 %v318_v58, %v253_v20 }
 0x1cb   :  { %v276_v30 = vmax.f32 %v268_v26, 0.0 }
 0x1cc   :  { %v280_v25 = vmax.f32 %v279_v23, %v273_v22  ;;  %v274_v27 = vmax.f32 %v266_v24, 0.0 }
 0x1ce   :  { %v281_v29 = vmax.f32 %v280_v25, %v274_v27 }
 0x1d0   :  { %v282_v31 = vmax.f32 %v281_v29, %v275_v28 }
 0x1d2   :  { %v283_v32 = vmax.f32 %v282_v31, %v276_v30 }
 0x1d4   :  { %297 = vrot.lane.b32.xlu1 %v283_v32, %s355_s4  ;;  %287 = vrot.lane.b32.xlu0 %v283_v32, %s356_s17  ;;  %285 = vst.msk [vmem:[%s455_s5] sm:$0x3] %vm284_vm4, %v283_v32 }
 0x1d8   :  { %292 = vrot.lane.b32.xlu0 %v283_v32, %s357_s20 }
 0x246   :  { %v288_v33 = vpop.permute.xlu0 %287  ;;  %v298_v35 = vpop.permute.xlu1 %297 }
 0x247   :  { %291 = vst.msk [vmem:[%s455_s5 - $0x2] sm:$0xc] %vm290_vm5, %v288_v33 }
 0x24a   :  { %v293_v34 = vpop.permute.xlu0 %292 }
 0x24b   :  { %296 = vst.msk [vmem:[%s455_s5 - $0x4] sm:$0x30] %vm295_vm6, %v293_v34 }
 0x24c   :  { %301 = vst.msk [vmem:[%s455_s5 - $0x6] sm:$0xc0] %vm300_vm7, %v298_v35 }

</bundles_post_ra>
